<compile_context>
chip_gen: v5e
topology: v5e:2x2
jax: 0.10.0
libtpu: 0.0.40
codegen_flags: <defaults>
</compile_context>

<pallas_src>
import functools

import jax
import jax.numpy as jnp
from jax.experimental import pallas as pl
from jax.experimental.pallas import tpu as pltpu


def _round_up(x, m):
    return ((x + m - 1) // m) * m


def _cdiv(a, b):
    return -(-a // b)


# ---------------------------------------------------------------------------
# Kernel body: fc1 -> ReLU -> fc2 -> ReLU -> fc3 on one batch tile.
# Weights/biases are VMEM-resident (constant index_map); MXU accumulates in f32.
# ---------------------------------------------------------------------------
def _fc_qnet_kernel(x_ref, w1_ref, b1_ref, w2_ref, b2_ref, w3_ref, b3_ref, o_ref):
    h1 = jnp.dot(x_ref[...], w1_ref[...], preferred_element_type=jnp.float32)
    h1 = jnp.maximum(h1 + b1_ref[...], 0.0)
    h2 = jnp.dot(h1.astype(w2_ref.dtype), w2_ref[...],
                 preferred_element_type=jnp.float32)
    h2 = jnp.maximum(h2 + b2_ref[...], 0.0)
    out = jnp.dot(h2.astype(w3_ref.dtype), w3_ref[...],
                  preferred_element_type=jnp.float32) + b3_ref[...]
    o_ref[...] = out.astype(o_ref.dtype)


# ---------------------------------------------------------------------------
# One-time probe: does this JAX build accept BlockSpec(pipeline_mode=pl.Buffered)?
# Guarantees the main kernel still runs (with default double-buffering) if not.
# ---------------------------------------------------------------------------
_BUFFERED_OK = None


def _buffered_pipeline_supported():
    global _BUFFERED_OK
    if _BUFFERED_OK is not None:
        return _BUFFERED_OK
    if not hasattr(pl, "Buffered"):
        _BUFFERED_OK = False
        return False

    def _copy(x_ref, o_ref):
        o_ref[...] = x_ref[...]

    try:
        probe = pl.pallas_call(
            _copy,
            out_shape=jax.ShapeDtypeStruct((32, 128), jnp.float32),
            grid=(4,),
            in_specs=[pl.BlockSpec((8, 128), lambda i: (0, 0),
                                   pipeline_mode=pl.Buffered(1))],
            out_specs=pl.BlockSpec((8, 128), lambda i: (i, 0),
                                   pipeline_mode=pl.Buffered(3)),
        )
        jax.block_until_ready(probe(jnp.zeros((8, 128), jnp.float32)))
        _BUFFERED_OK = True
    except Exception:
        _BUFFERED_OK = False
    return _BUFFERED_OK


def _spec(shape, index_map, buffers=None):
    if buffers is not None:
        return pl.BlockSpec(shape, index_map, pipeline_mode=pl.Buffered(buffers))
    return pl.BlockSpec(shape, index_map)


# ---------------------------------------------------------------------------
# Tiling policy: balanced batch tiles sized to an explicit VMEM budget.
# ---------------------------------------------------------------------------
_VMEM_BUDGET = 44 << 20      # v7x has only 64 MiB physical per TensorCore
_VMEM_LIMIT_CAP = 48 << 20   # never request (nearly) all of v7x's VMEM
_TILE_CAP = 1024             # big tiles amortize the ~0.35us/grid-step cost (v5e)


def _choose_tiling(B, IN_P, HID_P, OUT_P, x_itemsize, w_itemsize, out_itemsize,
                   use_buffered):
    w_bufs = 1 if use_buffered else 2
    act_bufs = 3 if use_buffered else 2
    weight_bytes = w_bufs * w_itemsize * (
        IN_P * HID_P + HID_P * HID_P + HID_P * OUT_P + 2 * HID_P + OUT_P)

    def act_bytes(tb):
        return (act_bufs * tb * IN_P * x_itemsize          # x stream buffers
                + act_bufs * tb * OUT_P * out_itemsize     # out stream buffers
                + 2 * tb * HID_P * 4)                      # f32 h1/h2 intermediates

    num_tiles = _cdiv(B, _TILE_CAP)
    if num_tiles < 2 and B >= 16:
        num_tiles = 2   # give v7x's 2nd TensorCore work (needs >= 2 grid steps)
    tile_b = _round_up(_cdiv(B, num_tiles), 8)
    while weight_bytes + act_bytes(tile_b) > _VMEM_BUDGET and tile_b > 8:
        num_tiles += 1
        tile_b = _round_up(_cdiv(B, num_tiles), 8)
    # TODO(synk): K-tile fc2 (extra "arbitrary" grid axis + f32 VMEM accumulator)
    # when the resident weights alone exceed the budget (hidden >~ 4096 in f32).
    return tile_b, num_tiles, weight_bytes + act_bytes(tile_b)


# ---------------------------------------------------------------------------
# Forward pass.
# ---------------------------------------------------------------------------
@functools.partial(jax.jit, static_argnames=("out_size", "use_buffered"))
def _fc_qnet_call(x, w1p, b1p, w2p, b2p, w3p, b3p, *, out_size, use_buffered):
    B, in_size = x.shape
    IN_P, HID_P = w1p.shape
    OUT_P = w3p.shape[1]

    x_itemsize = jnp.dtype(x.dtype).itemsize
    w_itemsize = jnp.dtype(w1p.dtype).itemsize

    tile_b, num_tiles, footprint = _choose_tiling(
        B, IN_P, HID_P, OUT_P, x_itemsize, w_itemsize, x_itemsize, use_buffered)
    B_P = num_tiles * tile_b

    xp = x
    if B_P != B or IN_P != in_size:
        xp = jnp.pad(x, ((0, B_P - B), (0, IN_P - in_size)))

    w_buf = 1 if use_buffered else None                       # constant blocks
    act_buf = 3 if (use_buffered and num_tiles >= 4) else None  # deeper x/out pipe

    flops = 2 * B_P * (IN_P * HID_P + HID_P * HID_P + HID_P * OUT_P)
    bytes_accessed = (
        w_itemsize * (IN_P * HID_P + HID_P * HID_P + HID_P * OUT_P + 2 * HID_P + OUT_P)
        + x_itemsize * (B_P * IN_P + B_P * OUT_P))
    vmem_limit = int(min(max(footprint + (12 << 20), 32 << 20), _VMEM_LIMIT_CAP))

    out_p = pl.pallas_call(
        _fc_qnet_kernel,
        out_shape=jax.ShapeDtypeStruct((B_P, OUT_P), x.dtype),
        grid=(num_tiles,),
        in_specs=[
            # Activations: tiled over batch, auto-pipelined.
            _spec((tile_b, IN_P), lambda i: (i, 0), act_buf),
            # Weights / biases: constant index_map => loaded once, VMEM-resident,
            # single-buffered (they never change across grid steps).
            _spec((IN_P, HID_P), lambda i: (0, 0), w_buf),
            _spec((1, HID_P), lambda i: (0, 0), w_buf),
            _spec((HID_P, HID_P), lambda i: (0, 0), w_buf),
            _spec((1, HID_P), lambda i: (0, 0), w_buf),
            _spec((HID_P, OUT_P), lambda i: (0, 0), w_buf),
            _spec((1, OUT_P), lambda i: (0, 0), w_buf),
        ],
        out_specs=_spec((tile_b, OUT_P), lambda i: (i, 0), act_buf),
        compiler_params=pltpu.CompilerParams(
            dimension_semantics=("parallel",),
            vmem_limit_bytes=vmem_limit,
        ),
        cost_estimate=pl.CostEstimate(
            flops=flops, transcendentals=0, bytes_accessed=bytes_accessed),
    )(xp, w1p, b1p, w2p, b2p, w3p, b3p)

    # Strip batch/lane padding only if padding actually occurred.
    if B_P != B or OUT_P != out_size:
        out_p = out_p[:B, :out_size]
    return out_p


def prepare_params(w1, b1, w2, b2, w3, b3):
    """Zero-pad params to 128-aligned shapes ONCE (hoisted out of the forward path).

    Returns (padded_params, out_size). jnp.pad is skipped (static check) when a
    matrix is already lane-aligned.
    """
    in_size, hidden = w1.shape
    out_size = w3.shape[1]
    IN_P, HID_P, OUT_P = (_round_up(d, 128) for d in (in_size, hidden, out_size))

    def pad2(a, rows, cols):
        r, c = a.shape
        if (r, c) == (rows, cols):
            return a
        return jnp.pad(a, ((0, rows - r), (0, cols - c)))

    padded = (pad2(w1, IN_P, HID_P), pad2(b1, 1, HID_P),
              pad2(w2, HID_P, HID_P), pad2(b2, 1, HID_P),
              pad2(w3, HID_P, OUT_P), pad2(b3, 1, OUT_P))
    return padded, out_size


def fc_qnet_forward(x, padded_params, out_size):
    """x: (B, input_size). padded_params from prepare_params(). Returns (B, out_size)."""
    return _fc_qnet_call(x, *padded_params, out_size=out_size,
                         use_buffered=_buffered_pipeline_supported())


def init_params(key, input_size, hidden_size, output_size, dtype=jnp.float32):
    """Matches nn.Linear's uniform(-1/sqrt(fan_in), 1/sqrt(fan_in)) init.

    Weights are stored pre-transposed as (in, out) so the kernel computes
    y = x @ W + b, matching PyTorch's y = x @ W_pt.T + b.
    Use dtype=jnp.bfloat16 on v6e/v7x for full MXU rate / half the weight DMA.
    """
    def linear(k, fan_in, fan_out):
        kw, kb = jax.random.split(k)
        bound = 1.0 / jnp.sqrt(fan_in)
        w = jax.random.uniform(kw, (fan_in, fan_out), jnp.float32, -bound, bound)
        b = jax.random.uniform(kb, (1, fan_out), jnp.float32, -bound, bound)
        return w.astype(dtype), b.astype(dtype)

    k1, k2, k3 = jax.random.split(key, 3)
    w1, b1 = linear(k1, input_size, hidden_size)
    w2, b2 = linear(k2, hidden_size, hidden_size)
    w3, b3 = linear(k3, hidden_size, output_size)
    return w1, b1, w2, b2, w3, b3


if __name__ == "__main__":
    key = jax.random.PRNGKey(0)
    batch, input_size, hidden_size, output_size = 8, 16, 32, 4

    kx, kp = jax.random.split(key)
    x = jax.random.normal(kx, (batch, input_size), jnp.float32)
    raw_params = init_params(kp, input_size, hidden_size, output_size)

    # Pad weights once, outside the per-call path.
    padded_params, out_size = prepare_params(*raw_params)

    out = fc_qnet_forward(x, padded_params, out_size)
    out = jax.block_until_ready(out)

    # Pure-JAX reference for sanity check.
    w1, b1, w2, b2, w3, b3 = raw_params
    ref = jnp.maximum(x @ w1 + b1, 0.0)
    ref = jnp.maximum(ref @ w2 + b2, 0.0)
    ref = ref @ w3 + b3
    assert out.shape == (batch, output_size)
    assert out.dtype == x.dtype
    assert jnp.allclose(out, ref, atol=1e-5, rtol=1e-5)

    print("KERNEL_OK")
</pallas_src>

<mosaic_0001>
module attributes {stable_mosaic.version = 11 : i64} {
  func.func @_fc_qnet_kernel(%arg0: i32, %arg1: memref<8x128xf32, #tpu.memory_space<vmem>>, %arg2: memref<128x128xf32, #tpu.memory_space<vmem>>, %arg3: memref<1x128xf32, #tpu.memory_space<vmem>>, %arg4: memref<128x128xf32, #tpu.memory_space<vmem>>, %arg5: memref<1x128xf32, #tpu.memory_space<vmem>>, %arg6: memref<128x128xf32, #tpu.memory_space<vmem>>, %arg7: memref<1x128xf32, #tpu.memory_space<vmem>>, %arg8: memref<8x128xf32, #tpu.memory_space<vmem>>) attributes {dimension_semantics = [#tpu.dimension_semantics<parallel>], iteration_bounds = array<i64: 1>, scalar_prefetch = 0 : i64, scratch_operands = 0 : i64, tpu.core_type = #tpu.core_type<tc>, window_params = [{transform_indices = @transform_0, window_bounds = array<i64: 8, 128>}, {pipeline_mode = #tpu.pipeline_mode<synchronous>, transform_indices = @transform_1, window_bounds = array<i64: 128, 128>}, {pipeline_mode = #tpu.pipeline_mode<synchronous>, transform_indices = @transform_2, window_bounds = array<i64: 1, 128>}, {pipeline_mode = #tpu.pipeline_mode<synchronous>, transform_indices = @transform_3, window_bounds = array<i64: 128, 128>}, {pipeline_mode = #tpu.pipeline_mode<synchronous>, transform_indices = @transform_4, window_bounds = array<i64: 1, 128>}, {pipeline_mode = #tpu.pipeline_mode<synchronous>, transform_indices = @transform_5, window_bounds = array<i64: 128, 128>}, {pipeline_mode = #tpu.pipeline_mode<synchronous>, transform_indices = @transform_6, window_bounds = array<i64: 1, 128>}, {transform_indices = @transform_7, window_bounds = array<i64: 8, 128>}]} {
    %c0 = arith.constant 0 : index
    %c0_0 = arith.constant 0 : index
    %0 = vector.load %arg1[%c0, %c0_0] : memref<8x128xf32, #tpu.memory_space<vmem>>, vector<8x128xf32>
    %c0_1 = arith.constant 0 : index
    %c0_2 = arith.constant 0 : index
    %1 = vector.load %arg2[%c0_1, %c0_2] : memref<128x128xf32, #tpu.memory_space<vmem>>, vector<128x128xf32>
    %cst = arith.constant dense<0.000000e+00> : vector<8x128xf32>
    %2 = tpu.matmul %0, %1, %cst {dimension_numbers = #tpu.dot_dimension_numbers<[1], [0], [0], [1], [0, 0, 1, 1], [], []>} : vector<8x128xf32>, vector<128x128xf32>, vector<8x128xf32> -> vector<8x128xf32>
    %c0_3 = arith.constant 0 : index
    %c0_4 = arith.constant 0 : index
    %3 = vector.load %arg3[%c0_3, %c0_4] : memref<1x128xf32, #tpu.memory_space<vmem>>, vector<1x128xf32>
    %4 = vector.broadcast %3 : vector<1x128xf32> to vector<8x128xf32>
    %5 = arith.addf %2, %4 : vector<8x128xf32>
    %cst_5 = arith.constant 0.000000e+00 : f32
    %6 = vector.broadcast %cst_5 : f32 to vector<8x128xf32>
    %7 = arith.maximumf %5, %6 : vector<8x128xf32>
    %c0_6 = arith.constant 0 : index
    %c0_7 = arith.constant 0 : index
    %8 = vector.load %arg4[%c0_6, %c0_7] : memref<128x128xf32, #tpu.memory_space<vmem>>, vector<128x128xf32>
    %cst_8 = arith.constant dense<0.000000e+00> : vector<8x128xf32>
    %9 = tpu.matmul %7, %8, %cst_8 {dimension_numbers = #tpu.dot_dimension_numbers<[1], [0], [0], [1], [0, 0, 1, 1], [], []>} : vector<8x128xf32>, vector<128x128xf32>, vector<8x128xf32> -> vector<8x128xf32>
    %c0_9 = arith.constant 0 : index
    %c0_10 = arith.constant 0 : index
    %10 = vector.load %arg5[%c0_9, %c0_10] : memref<1x128xf32, #tpu.memory_space<vmem>>, vector<1x128xf32>
    %11 = vector.broadcast %10 : vector<1x128xf32> to vector<8x128xf32>
    %12 = arith.addf %9, %11 : vector<8x128xf32>
    %cst_11 = arith.constant 0.000000e+00 : f32
    %13 = vector.broadcast %cst_11 : f32 to vector<8x128xf32>
    %14 = arith.maximumf %12, %13 : vector<8x128xf32>
    %c0_12 = arith.constant 0 : index
    %c0_13 = arith.constant 0 : index
    %15 = vector.load %arg6[%c0_12, %c0_13] : memref<128x128xf32, #tpu.memory_space<vmem>>, vector<128x128xf32>
    %cst_14 = arith.constant dense<0.000000e+00> : vector<8x128xf32>
    %16 = tpu.matmul %14, %15, %cst_14 {dimension_numbers = #tpu.dot_dimension_numbers<[1], [0], [0], [1], [0, 0, 1, 1], [], []>} : vector<8x128xf32>, vector<128x128xf32>, vector<8x128xf32> -> vector<8x128xf32>
    %c0_15 = arith.constant 0 : index
    %c0_16 = arith.constant 0 : index
    %17 = vector.load %arg7[%c0_15, %c0_16] : memref<1x128xf32, #tpu.memory_space<vmem>>, vector<1x128xf32>
    %18 = vector.broadcast %17 : vector<1x128xf32> to vector<8x128xf32>
    %19 = arith.addf %16, %18 : vector<8x128xf32>
    %c0_17 = arith.constant 0 : index
    %c0_18 = arith.constant 0 : index
    %20 = vector.load %arg8[%c0_17, %c0_18] : memref<8x128xf32, #tpu.memory_space<vmem>>, vector<8x128xf32>
    tpu.vector_store %arg8[%c0_17, %c0_18], %19 {strides = array<i32>} : memref<8x128xf32, #tpu.memory_space<vmem>>, vector<8x128xf32>,
    return
  }
  func.func @transform_0(%arg0: i32) -> (i32, i32) {
    %c0_i32 = arith.constant 0 : i32
    %c0_i32_0 = arith.constant 0 : i32
    return %arg0, %c0_i32 : i32, i32
  }
  func.func @transform_1(%arg0: i32) -> (i32, i32) {
    %c0_i32 = arith.constant 0 : i32
    %c0_i32_0 = arith.constant 0 : i32
    %c0_i32_1 = arith.constant 0 : i32
    return %c0_i32, %c0_i32_0 : i32, i32
  }
  func.func @transform_2(%arg0: i32) -> (i32, i32) {
    %c0_i32 = arith.constant 0 : i32
    %c0_i32_0 = arith.constant 0 : i32
    %c0_i32_1 = arith.constant 0 : i32
    return %c0_i32, %c0_i32_0 : i32, i32
  }
  func.func @transform_3(%arg0: i32) -> (i32, i32) {
    %c0_i32 = arith.constant 0 : i32
    %c0_i32_0 = arith.constant 0 : i32
    %c0_i32_1 = arith.constant 0 : i32
    return %c0_i32, %c0_i32_0 : i32, i32
  }
  func.func @transform_4(%arg0: i32) -> (i32, i32) {
    %c0_i32 = arith.constant 0 : i32
    %c0_i32_0 = arith.constant 0 : i32
    %c0_i32_1 = arith.constant 0 : i32
    return %c0_i32, %c0_i32_0 : i32, i32
  }
  func.func @transform_5(%arg0: i32) -> (i32, i32) {
    %c0_i32 = arith.constant 0 : i32
    %c0_i32_0 = arith.constant 0 : i32
    %c0_i32_1 = arith.constant 0 : i32
    return %c0_i32, %c0_i32_0 : i32, i32
  }
  func.func @transform_6(%arg0: i32) -> (i32, i32) {
    %c0_i32 = arith.constant 0 : i32
    %c0_i32_0 = arith.constant 0 : i32
    %c0_i32_1 = arith.constant 0 : i32
    return %c0_i32, %c0_i32_0 : i32, i32
  }
  func.func @transform_7(%arg0: i32) -> (i32, i32) {
    %c0_i32 = arith.constant 0 : i32
    %c0_i32_0 = arith.constant 0 : i32
    return %arg0, %c0_i32 : i32, i32
  }
}

</mosaic_0001>

<bundles_post_ra>
// kernel: _fc_qnet_call.1
= control target key start
LH: loop header
LB: loop body
LE: loop exit
PB: predicated region body
PF: predicated region fallthrough
CT: control target
= control target key end

     0   :  { %12 = vsyncpa [#allocation3], 0  ;;  %s356_s0 = inlined_call_operand.vmem [shape: f32[8,128], index: 0, kind: input, shape index: {}]   ;;  %s357_s1 = inlined_call_operand.hbm [shape: f32[128,128], index: 1, kind: input, shape index: {}]   ;;  %s358_s2 = inlined_call_operand.vmem [shape: f32[1,128], index: 2, kind: input, shape index: {}]   ;;  %s359_s3 = inlined_call_operand.hbm [shape: f32[128,128], index: 3, kind: input, shape index: {}]   ;;  %s360_s4 = inlined_call_operand.vmem [shape: f32[1,128], index: 4, kind: input, shape index: {}]   ;;  %s361_s5 = inlined_call_operand.hbm [shape: f32[128,128], index: 5, kind: input, shape index: {}]   ;;  %s362_s6 = inlined_call_operand.vmem [shape: f32[1,128], index: 6, kind: input, shape index: {}]   ;;  %s363_s7 = inlined_call_operand.vmem [shape: f32[8,128], index: 7, kind: output, shape index: {}]  }
   0x1   :  { %13 = vsyncpa [#allocation5], 0  ;;  %s35_s26 = sshll.u32 %s359_s3, 4  ;;  %s287_s27 = smov [#allocation4]   ;;  %s36_s26 = int_to_ptr.hbm [resolvable:$true] %s35_s26 }
   0x2   :  { %s37_s28 = sshll.u32 %s287_s27, 4  ;;  %s20_s8 = sshll.u32 %s357_s1, 4  ;;  %s38_s28 = int_to_ptr.vmem [resolvable:$true] %s37_s28  ;;  %s21_s8 = int_to_ptr.hbm [resolvable:$true] %s20_s8 }
   0x3   :  { %s288_s9 = smov 128   ;;  %s289_s10 = smov 8  }
   0x4   :  { %43 = dma.hbm_to_vmem [thread:$0]  %s36_s26, 2048, %s38_s28, [#allocation5], %s288_s9, %s288_s9, %s289_s10  }
   0x5   :  { %s290_s11 = smov [#allocation2]   ;;  %s50_s15 = sshll.u32 %s361_s5, 4  ;;  %s51_s15 = int_to_ptr.hbm [resolvable:$true] %s50_s15 }
   0x6   :  { %s22_s12 = sshll.u32 %s290_s11, 4  ;;  %s291_s3 = smov [#allocation6]   ;;  %s23_s12 = int_to_ptr.vmem [resolvable:$true] %s22_s12 }
   0x7   :  { %28 = dma.hbm_to_vmem [thread:$0]  %s21_s8, 2048, %s23_s12, [#allocation3], %s288_s9, %s288_s9, %s289_s10  }
   0x8   :  { %s52_s16 = sshll.u32 %s291_s3, 4  ;;  %s53_s16 = int_to_ptr.vmem [resolvable:$true] %s52_s16 }
   0x9   :  { %58 = dma.hbm_to_vmem [thread:$0]  %s51_s15, 2048, %s53_s16, [#allocation5], %s288_s9, %s288_s9, %s289_s10  }
   0xa   :  { %283 = dma.done.wait [#allocation3], 2048  }
   0xb   :  { %284 = vsyncadd [#allocation3], 4294965248 }
   0xc   :  { %285 = dma.done.wait [#allocation5], 4096  }
   0xd   :  { %286 = vsyncadd [#allocation5], 4294963200  ;;  %v89_v0 = vld [vmem:[#allocation2 + $0x78] sm:$0xff]  ;;  %v88_v1 = vld [vmem:[#allocation2 + $0x70] sm:$0xff] }
   0xe   :  { %94 = vmatpush.msra.mxu0 %v89_v0  ;;  %v87_v2 = vld [vmem:[#allocation2 + $0x68] sm:$0xff]  ;;  %v86_v3 = vld [vmem:[#allocation2 + $0x60] sm:$0xff]  ;;  %v130_v4 = vld [vmem:[#allocation4 + $0x78] sm:$0xff] }
   0xf   :  { %v85_v5 = vld [vmem:[#allocation2 + $0x58] sm:$0xff]  ;;  %135 = vmatpush.msra.mxu1 %v130_v4  ;;  %v129_v6 = vld [vmem:[#allocation4 + $0x70] sm:$0xff]  ;;  %v128_v7 = vld [vmem:[#allocation4 + $0x68] sm:$0xff] }
  0x10   :  { %95 = vmatpush.msra.mxu0 %v88_v1  ;;  %v84_v8 = vld [vmem:[#allocation2 + $0x50] sm:$0xff]  ;;  %v127_v9 = vld [vmem:[#allocation4 + $0x60] sm:$0xff]  ;;  %v83_v10 = vld [vmem:[#allocation2 + $0x48] sm:$0xff] }
  0x11   :  { %136 = vmatpush.msra.mxu1 %v129_v6  ;;  %v126_v11 = vld [vmem:[#allocation4 + $0x58] sm:$0xff]  ;;  %v82_v12 = vld [vmem:[#allocation2 + $0x40] sm:$0xff]  ;;  %v125_v13 = vld [vmem:[#allocation4 + $0x50] sm:$0xff] }
  0x12   :  { %96 = vmatpush.msra.mxu0 %v87_v2  ;;  %v81_v14 = vld [vmem:[#allocation2 + $0x38] sm:$0xff]  ;;  %v124_v15 = vld [vmem:[#allocation4 + $0x48] sm:$0xff]  ;;  %v80_v16 = vld [vmem:[#allocation2 + $0x30] sm:$0xff] }
  0x13   :  { %137 = vmatpush.msra.mxu1 %v128_v7  ;;  %v123_v17 = vld [vmem:[#allocation4 + $0x40] sm:$0xff]  ;;  %v79_v18 = vld [vmem:[#allocation2 + $0x28] sm:$0xff]  ;;  %v122_v19 = vld [vmem:[#allocation4 + $0x38] sm:$0xff] }
  0x14   :  { %97 = vmatpush.msra.mxu0 %v86_v3  ;;  %v78_v20 = vld [vmem:[#allocation2 + $0x20] sm:$0xff]  ;;  %v121_v21 = vld [vmem:[#allocation4 + $0x30] sm:$0xff]  ;;  %v77_v22 = vld [vmem:[#allocation2 + $0x18] sm:$0xff] }
  0x15   :  { %138 = vmatpush.msra.mxu1 %v127_v9  ;;  %v120_v23 = vld [vmem:[#allocation4 + $0x28] sm:$0xff]  ;;  %v76_v24 = vld [vmem:[#allocation2 + $0x10] sm:$0xff]  ;;  %v119_v25 = vld [vmem:[#allocation4 + $0x20] sm:$0xff] }
  0x16   :  { %98 = vmatpush.msra.mxu0 %v85_v5  ;;  %v75_v26 = vld [vmem:[#allocation2 + $0x8] sm:$0xff]  ;;  %v118_v27 = vld [vmem:[#allocation4 + $0x18] sm:$0xff]  ;;  %v74_v28 = vld [vmem:[#allocation2] sm:$0xff] }
  0x17   :  { %139 = vmatpush.msra.mxu1 %v126_v11  ;;  %v73_v29 = vld [vmem:[%s356_s0] sm:$0xff]  ;;  %v117_v30 = vld [vmem:[#allocation4 + $0x10] sm:$0xff]  ;;  %v116_v31 = vld [vmem:[#allocation4 + $0x8] sm:$0xff] }
  0x18   :  { %99 = vmatpush.msra.mxu0 %v84_v8  ;;  %v115_v32 = vld [vmem:[#allocation4] sm:$0xff]  ;;  %v171_v33 = vld [vmem:[#allocation6 + $0x78] sm:$0xff]  ;;  %v170_v34 = vld [vmem:[#allocation6 + $0x70] sm:$0xff] }
  0x19   :  { %140 = vmatpush.msra.mxu1 %v125_v13  ;;  %176 = vmatpush.msra.mxu2 %v171_v33  ;;  %v169_v35 = vld [vmem:[#allocation6 + $0x68] sm:$0xff]  ;;  %v168_v36 = vld [vmem:[#allocation6 + $0x60] sm:$0xff]  ;;  %v167_v37 = vld [vmem:[#allocation6 + $0x58] sm:$0xff] }
  0x1a   :  { %100 = vmatpush.msra.mxu0 %v83_v10  ;;  %v166_v38 = vld [vmem:[#allocation6 + $0x50] sm:$0xff]  ;;  %v165_v39 = vld [vmem:[#allocation6 + $0x48] sm:$0xff]  ;;  %v164_v40 = vld [vmem:[#allocation6 + $0x40] sm:$0xff] }
  0x1b   :  { %141 = vmatpush.msra.mxu1 %v124_v15  ;;  %177 = vmatpush.msra.mxu2 %v170_v34  ;;  %v163_v41 = vld [vmem:[#allocation6 + $0x38] sm:$0xff]  ;;  %v162_v42 = vld [vmem:[#allocation6 + $0x30] sm:$0xff]  ;;  %v161_v43 = vld [vmem:[#allocation6 + $0x28] sm:$0xff] }
  0x1c   :  { %101 = vmatpush.msra.mxu0 %v82_v12  ;;  %v160_v44 = vld [vmem:[#allocation6 + $0x20] sm:$0xff]  ;;  %v159_v45 = vld [vmem:[#allocation6 + $0x18] sm:$0xff]  ;;  %v158_v50 = vld [vmem:[#allocation6 + $0x10] sm:$0xff] }
  0x1d   :  { %142 = vmatpush.msra.mxu1 %v123_v17  ;;  %178 = vmatpush.msra.mxu2 %v169_v35  ;;  %v208_v46 = vld [vmem:[%s358_s2] ss:$0 sm:$0xff]  ;;  %v157_v51 = vld [vmem:[#allocation6 + $0x8] sm:$0xff] }
  0x1e   :  { %102 = vmatpush.msra.mxu0 %v81_v14  ;;  %v156_v52 = vld [vmem:[#allocation6] sm:$0xff] }
  0x1f   :  { %143 = vmatpush.msra.mxu1 %v122_v19  ;;  %179 = vmatpush.msra.mxu2 %v168_v36  ;;  %v209_v53 = vld [vmem:[%s360_s4] ss:$0 sm:$0xff] }
  0x20   :  { %103 = vmatpush.msra.mxu0 %v80_v16  ;;  %v210_v57 = vld [vmem:[%s362_s6] ss:$0 sm:$0xff] }
  0x21   :  { %144 = vmatpush.msra.mxu1 %v121_v21  ;;  %180 = vmatpush.msra.mxu2 %v167_v37 }
  0x22   :  { %104 = vmatpush.msra.mxu0 %v79_v18 }
  0x23   :  { %145 = vmatpush.msra.mxu1 %v120_v23  ;;  %181 = vmatpush.msra.mxu2 %v166_v38 }
  0x24   :  { %105 = vmatpush.msra.mxu0 %v78_v20 }
  0x25   :  { %146 = vmatpush.msra.mxu1 %v119_v25  ;;  %182 = vmatpush.msra.mxu2 %v165_v39 }
  0x26   :  { %106 = vmatpush.msra.mxu0 %v77_v22 }
  0x27   :  { %147 = vmatpush.msra.mxu1 %v118_v27  ;;  %183 = vmatpush.msra.mxu2 %v164_v40 }
  0x28   :  { %107 = vmatpush.msra.mxu0 %v76_v24 }
  0x29   :  { %148 = vmatpush.msra.mxu1 %v117_v30  ;;  %184 = vmatpush.msra.mxu2 %v163_v41 }
  0x2a   :  { %108 = vmatpush.msra.mxu0 %v75_v26 }
  0x2b   :  { %149 = vmatpush.msra.mxu1 %v116_v31  ;;  %185 = vmatpush.msra.mxu2 %v162_v42 }
  0x2c   :  { %109 = vmatpush.msra.mxu0 %v74_v28 }
  0x2d   :  { %110 = vmatmul.f32.vlgmr.msra.gmra.mxu0 %v73_v29  ;;  %150 = vmatpush.msra.mxu1 %v115_v32 }
  0x2e   :  { %186 = vmatpush.msra.mxu2 %v161_v43 }
  0x30   :  { %187 = vmatpush.msra.mxu2 %v160_v44 }
  0x32   :  { %188 = vmatpush.msra.mxu2 %v159_v45 }
  0x34   :  { %189 = vmatpush.msra.mxu2 %v158_v50 }
  0x36   :  { %190 = vmatpush.msra.mxu2 %v157_v51 }
  0x38   :  { %191 = vmatpush.msra.mxu2 %v156_v52 }
  0xaa   :  { %v111_v47 = vpop.f32.mrf.mxu0 }
  0xab   :  { %v112_v48 = vadd.f32 %v208_v46, %v111_v47 }
  0xad   :  { %v114_v49 = vmax.f32 %v112_v48, 0.0 }
  0xaf   :  { %151 = vmatmul.f32.vlgmr.msra.gmra.mxu1 %v114_v49 }
 0x12c   :  { %v152_v54 = vpop.f32.mrf.mxu1 }
 0x12d   :  { %v153_v55 = vadd.f32 %v209_v53, %v152_v54 }
 0x12f   :  { %v155_v56 = vmax.f32 %v153_v55, 0.0 }
 0x131   :  { %192 = vmatmul.f32.vlgmr.msra.gmra.mxu2 %v155_v56 }
 0x1b4   :  { %v193_v58 = vpop.f32.mrf.mxu2 }
 0x1b5   :  { %v194_v59 = vadd.f32 %v210_v57, %v193_v58 }
 0x1b7   :  { %196 = vst [vmem:[%s363_s7] sm:$0xff] %v194_v59 }
 0x1b8   :  { %201 = vsyncpa [#allocation3], 1 }
 0x1b9   :  { %202 = vsyncpa [#allocation5], 1 }

</bundles_post_ra>
